<compile_context>
chip_gen: v5e
topology: v5e:2x2
jax: 0.10.0
libtpu: 0.0.40
codegen_flags: <defaults>
</compile_context>

<pallas_src>
import functools

import jax
import jax.numpy as jnp
from jax.experimental import pallas as pl
from jax.experimental.pallas import tpu as pltpu

LANE = 128     # TPU lane width (last dim)
SUBLANE = 8    # TPU sublane width (second-to-last dim, f32)


def _round_up(n, m):
    return ((n + m - 1) // m) * m


def _fused_mlp_kernel(x_ref, *refs, n_layers):
    """Chained (x @ W + b) -> ReLU ... -> final linear, entirely in VMEM/vregs.

    refs = (w0, b0, w1, b1, ..., w_{n-1}, b_{n-1}, out_ref)
    """
    o_ref = refs[-1]
    wb = refs[:-1]
    h = x_ref[...]
    for i in range(n_layers):
        w = wb[2 * i][...]
        b = wb[2 * i + 1][...]          # (1, fo_pad) broadcasts over batch tile
        h = jnp.dot(h, w, preferred_element_type=jnp.float32) + b
        if i < n_layers - 1:
            h = jnp.maximum(h, 0.0)     # ReLU on all hidden layers
    o_ref[...] = h.astype(o_ref.dtype)


def fused_mlp(x_pad, padded_params, *, tm):
    """x_pad: (Bp, in_pad) f32, padded_params: [(W_pad, b_pad), ...] lane-padded."""
    n_layers = len(padded_params)
    Bp, in_pad = x_pad.shape
    out_pad = padded_params[-1][0].shape[1]
    assert Bp % tm == 0

    flat_wb = []
    wb_specs = []
    for w, b in padded_params:
        flat_wb += [w, b]
        # Weights/biases: same (full) block for every grid step -> VMEM-resident.
        wb_specs.append(pl.BlockSpec(w.shape, lambda i: (0, 0)))
        wb_specs.append(pl.BlockSpec(b.shape, lambda i: (0, 0)))

    flops = 2 * Bp * sum(w.shape[0] * w.shape[1] for w, _ in padded_params)
    bytes_accessed = 4 * (x_pad.size + Bp * out_pad
                          + sum(w.size + b.size for w, b in padded_params))

    return pl.pallas_call(
        functools.partial(_fused_mlp_kernel, n_layers=n_layers),
        out_shape=jax.ShapeDtypeStruct((Bp, out_pad), jnp.float32),
        grid=(Bp // tm,),
        in_specs=[pl.BlockSpec((tm, in_pad), lambda i: (i, 0))] + wb_specs,
        out_specs=pl.BlockSpec((tm, out_pad), lambda i: (i, 0)),
        compiler_params=pltpu.CompilerParams(
            dimension_semantics=("parallel",)),
        cost_estimate=pl.CostEstimate(
            flops=flops, transcendentals=0, bytes_accessed=bytes_accessed),
    )(x_pad, *flat_wb)


def init_mlp_params(key, input_size, output_size, layers=2, hidden_size=64):
    """PyTorch nn.Linear default init: U(-k, k), k = 1/sqrt(fan_in).

    Weights stored transposed vs. PyTorch: W has shape (in, out) so the
    kernel computes y = x @ W + b directly on the MXU.
    """
    dims = [input_size] + [hidden_size] * (layers + 1) + [output_size]
    params = []
    for i in range(len(dims) - 1):
        fan_in, fan_out = dims[i], dims[i + 1]
        key, kw, kb = jax.random.split(key, 3)
        bound = 1.0 / (fan_in ** 0.5)
        w = jax.random.uniform(kw, (fan_in, fan_out), jnp.float32, -bound, bound)
        b = jax.random.uniform(kb, (1, fan_out), jnp.float32, -bound, bound)
        params.append((w, b))
    return params


def pad_params(params):
    """Zero-pad every feature dim to a multiple of 128 lanes (done once)."""
    padded = []
    for w, b in params:
        fi, fo = w.shape
        fi_p, fo_p = _round_up(fi, LANE), _round_up(fo, LANE)
        wp = jnp.zeros((fi_p, fo_p), jnp.float32).at[:fi, :fo].set(w)
        bp = jnp.zeros((1, fo_p), jnp.float32).at[:, :fo].set(b)
        padded.append((wp, bp))
    return padded


@functools.partial(jax.jit, static_argnames=("out_size",))
def mlp_forward(x, padded_params, out_size):
    """Forward pass. x: (B, in) f32 -> (B, out_size) f32."""
    B, fin = x.shape
    in_pad = padded_params[0][0].shape[0]
    # Batch tile: multiple of 8 sublanes, capped at 512 rows (VMEM-safe on v7x).
    tm = min(512, _round_up(B, SUBLANE))
    Bp = _round_up(B, tm)
    x_pad = jnp.zeros((Bp, in_pad), jnp.float32).at[:B, :fin].set(x)
    y_pad = fused_mlp(x_pad, padded_params, tm=tm)
    return y_pad[:B, :out_size]


if __name__ == "__main__":
    key = jax.random.PRNGKey(0)
    batch, input_size, output_size, hidden_size, layers = 8, 16, 8, 64, 2

    k_params, k_x = jax.random.split(key)
    params = init_mlp_params(k_params, input_size, output_size,
                             layers=layers, hidden_size=hidden_size)
    padded_params = pad_params(params)
    x = jax.random.normal(k_x, (batch, input_size), jnp.float32)

    out = mlp_forward(x, padded_params, out_size=output_size)
    jax.block_until_ready(out)

    # Reference check in plain JAX with the unpadded parameters.
    ref = x
    for i, (w, b) in enumerate(params):
        ref = ref @ w + b
        if i < len(params) - 1:
            ref = jnp.maximum(ref, 0.0)
    assert out.shape == (batch, output_size)
    assert jnp.allclose(out, ref, atol=1e-5, rtol=1e-5)

    print("KERNEL_OK")
</pallas_src>

<mosaic_0001>
module attributes {stable_mosaic.version = 11 : i64} {
  func.func @_fused_mlp_kernel(%arg0: i32, %arg1: memref<8x128xf32, #tpu.memory_space<vmem>>, %arg2: memref<128x128xf32, #tpu.memory_space<vmem>>, %arg3: memref<1x128xf32, #tpu.memory_space<vmem>>, %arg4: memref<128x128xf32, #tpu.memory_space<vmem>>, %arg5: memref<1x128xf32, #tpu.memory_space<vmem>>, %arg6: memref<128x128xf32, #tpu.memory_space<vmem>>, %arg7: memref<1x128xf32, #tpu.memory_space<vmem>>, %arg8: memref<128x128xf32, #tpu.memory_space<vmem>>, %arg9: memref<1x128xf32, #tpu.memory_space<vmem>>, %arg10: memref<8x128xf32, #tpu.memory_space<vmem>>) attributes {dimension_semantics = [#tpu.dimension_semantics<parallel>], iteration_bounds = array<i64: 1>, scalar_prefetch = 0 : i64, scratch_operands = 0 : i64, tpu.core_type = #tpu.core_type<tc>, window_params = [{transform_indices = @transform_0, window_bounds = array<i64: 8, 128>}, {pipeline_mode = #tpu.pipeline_mode<synchronous>, transform_indices = @transform_1, window_bounds = array<i64: 128, 128>}, {pipeline_mode = #tpu.pipeline_mode<synchronous>, transform_indices = @transform_2, window_bounds = array<i64: 1, 128>}, {pipeline_mode = #tpu.pipeline_mode<synchronous>, transform_indices = @transform_3, window_bounds = array<i64: 128, 128>}, {pipeline_mode = #tpu.pipeline_mode<synchronous>, transform_indices = @transform_4, window_bounds = array<i64: 1, 128>}, {pipeline_mode = #tpu.pipeline_mode<synchronous>, transform_indices = @transform_5, window_bounds = array<i64: 128, 128>}, {pipeline_mode = #tpu.pipeline_mode<synchronous>, transform_indices = @transform_6, window_bounds = array<i64: 1, 128>}, {pipeline_mode = #tpu.pipeline_mode<synchronous>, transform_indices = @transform_7, window_bounds = array<i64: 128, 128>}, {pipeline_mode = #tpu.pipeline_mode<synchronous>, transform_indices = @transform_8, window_bounds = array<i64: 1, 128>}, {transform_indices = @transform_9, window_bounds = array<i64: 8, 128>}]} {
    %c0 = arith.constant 0 : index
    %c0_0 = arith.constant 0 : index
    %0 = vector.load %arg1[%c0, %c0_0] : memref<8x128xf32, #tpu.memory_space<vmem>>, vector<8x128xf32>
    %c0_1 = arith.constant 0 : index
    %c0_2 = arith.constant 0 : index
    %1 = vector.load %arg2[%c0_1, %c0_2] : memref<128x128xf32, #tpu.memory_space<vmem>>, vector<128x128xf32>
    %c0_3 = arith.constant 0 : index
    %c0_4 = arith.constant 0 : index
    %2 = vector.load %arg3[%c0_3, %c0_4] : memref<1x128xf32, #tpu.memory_space<vmem>>, vector<1x128xf32>
    %cst = arith.constant dense<0.000000e+00> : vector<8x128xf32>
    %3 = tpu.matmul %0, %1, %cst {dimension_numbers = #tpu.dot_dimension_numbers<[1], [0], [0], [1], [0, 0, 1, 1], [], []>} : vector<8x128xf32>, vector<128x128xf32>, vector<8x128xf32> -> vector<8x128xf32>
    %4 = vector.broadcast %2 : vector<1x128xf32> to vector<8x128xf32>
    %5 = arith.addf %3, %4 : vector<8x128xf32>
    %cst_5 = arith.constant 0.000000e+00 : f32
    %6 = vector.broadcast %cst_5 : f32 to vector<8x128xf32>
    %7 = arith.maximumf %5, %6 : vector<8x128xf32>
    %c0_6 = arith.constant 0 : index
    %c0_7 = arith.constant 0 : index
    %8 = vector.load %arg4[%c0_6, %c0_7] : memref<128x128xf32, #tpu.memory_space<vmem>>, vector<128x128xf32>
    %c0_8 = arith.constant 0 : index
    %c0_9 = arith.constant 0 : index
    %9 = vector.load %arg5[%c0_8, %c0_9] : memref<1x128xf32, #tpu.memory_space<vmem>>, vector<1x128xf32>
    %cst_10 = arith.constant dense<0.000000e+00> : vector<8x128xf32>
    %10 = tpu.matmul %7, %8, %cst_10 {dimension_numbers = #tpu.dot_dimension_numbers<[1], [0], [0], [1], [0, 0, 1, 1], [], []>} : vector<8x128xf32>, vector<128x128xf32>, vector<8x128xf32> -> vector<8x128xf32>
    %11 = vector.broadcast %9 : vector<1x128xf32> to vector<8x128xf32>
    %12 = arith.addf %10, %11 : vector<8x128xf32>
    %cst_11 = arith.constant 0.000000e+00 : f32
    %13 = vector.broadcast %cst_11 : f32 to vector<8x128xf32>
    %14 = arith.maximumf %12, %13 : vector<8x128xf32>
    %c0_12 = arith.constant 0 : index
    %c0_13 = arith.constant 0 : index
    %15 = vector.load %arg6[%c0_12, %c0_13] : memref<128x128xf32, #tpu.memory_space<vmem>>, vector<128x128xf32>
    %c0_14 = arith.constant 0 : index
    %c0_15 = arith.constant 0 : index
    %16 = vector.load %arg7[%c0_14, %c0_15] : memref<1x128xf32, #tpu.memory_space<vmem>>, vector<1x128xf32>
    %cst_16 = arith.constant dense<0.000000e+00> : vector<8x128xf32>
    %17 = tpu.matmul %14, %15, %cst_16 {dimension_numbers = #tpu.dot_dimension_numbers<[1], [0], [0], [1], [0, 0, 1, 1], [], []>} : vector<8x128xf32>, vector<128x128xf32>, vector<8x128xf32> -> vector<8x128xf32>
    %18 = vector.broadcast %16 : vector<1x128xf32> to vector<8x128xf32>
    %19 = arith.addf %17, %18 : vector<8x128xf32>
    %cst_17 = arith.constant 0.000000e+00 : f32
    %20 = vector.broadcast %cst_17 : f32 to vector<8x128xf32>
    %21 = arith.maximumf %19, %20 : vector<8x128xf32>
    %c0_18 = arith.constant 0 : index
    %c0_19 = arith.constant 0 : index
    %22 = vector.load %arg8[%c0_18, %c0_19] : memref<128x128xf32, #tpu.memory_space<vmem>>, vector<128x128xf32>
    %c0_20 = arith.constant 0 : index
    %c0_21 = arith.constant 0 : index
    %23 = vector.load %arg9[%c0_20, %c0_21] : memref<1x128xf32, #tpu.memory_space<vmem>>, vector<1x128xf32>
    %cst_22 = arith.constant dense<0.000000e+00> : vector<8x128xf32>
    %24 = tpu.matmul %21, %22, %cst_22 {dimension_numbers = #tpu.dot_dimension_numbers<[1], [0], [0], [1], [0, 0, 1, 1], [], []>} : vector<8x128xf32>, vector<128x128xf32>, vector<8x128xf32> -> vector<8x128xf32>
    %25 = vector.broadcast %23 : vector<1x128xf32> to vector<8x128xf32>
    %26 = arith.addf %24, %25 : vector<8x128xf32>
    %c0_23 = arith.constant 0 : index
    %c0_24 = arith.constant 0 : index
    %27 = vector.load %arg10[%c0_23, %c0_24] : memref<8x128xf32, #tpu.memory_space<vmem>>, vector<8x128xf32>
    tpu.vector_store %arg10[%c0_23, %c0_24], %26 {strides = array<i32>} : memref<8x128xf32, #tpu.memory_space<vmem>>, vector<8x128xf32>,
    return
  }
  func.func @transform_0(%arg0: i32) -> (i32, i32) {
    %c0_i32 = arith.constant 0 : i32
    %c0_i32_0 = arith.constant 0 : i32
    return %arg0, %c0_i32 : i32, i32
  }
  func.func @transform_1(%arg0: i32) -> (i32, i32) {
    %c0_i32 = arith.constant 0 : i32
    %c0_i32_0 = arith.constant 0 : i32
    %c0_i32_1 = arith.constant 0 : i32
    return %c0_i32, %c0_i32_0 : i32, i32
  }
  func.func @transform_2(%arg0: i32) -> (i32, i32) {
    %c0_i32 = arith.constant 0 : i32
    %c0_i32_0 = arith.constant 0 : i32
    %c0_i32_1 = arith.constant 0 : i32
    return %c0_i32, %c0_i32_0 : i32, i32
  }
  func.func @transform_3(%arg0: i32) -> (i32, i32) {
    %c0_i32 = arith.constant 0 : i32
    %c0_i32_0 = arith.constant 0 : i32
    %c0_i32_1 = arith.constant 0 : i32
    return %c0_i32, %c0_i32_0 : i32, i32
  }
  func.func @transform_4(%arg0: i32) -> (i32, i32) {
    %c0_i32 = arith.constant 0 : i32
    %c0_i32_0 = arith.constant 0 : i32
    %c0_i32_1 = arith.constant 0 : i32
    return %c0_i32, %c0_i32_0 : i32, i32
  }
  func.func @transform_5(%arg0: i32) -> (i32, i32) {
    %c0_i32 = arith.constant 0 : i32
    %c0_i32_0 = arith.constant 0 : i32
    %c0_i32_1 = arith.constant 0 : i32
    return %c0_i32, %c0_i32_0 : i32, i32
  }
  func.func @transform_6(%arg0: i32) -> (i32, i32) {
    %c0_i32 = arith.constant 0 : i32
    %c0_i32_0 = arith.constant 0 : i32
    %c0_i32_1 = arith.constant 0 : i32
    return %c0_i32, %c0_i32_0 : i32, i32
  }
  func.func @transform_7(%arg0: i32) -> (i32, i32) {
    %c0_i32 = arith.constant 0 : i32
    %c0_i32_0 = arith.constant 0 : i32
    %c0_i32_1 = arith.constant 0 : i32
    return %c0_i32, %c0_i32_0 : i32, i32
  }
  func.func @transform_8(%arg0: i32) -> (i32, i32) {
    %c0_i32 = arith.constant 0 : i32
    %c0_i32_0 = arith.constant 0 : i32
    %c0_i32_1 = arith.constant 0 : i32
    return %c0_i32, %c0_i32_0 : i32, i32
  }
  func.func @transform_9(%arg0: i32) -> (i32, i32) {
    %c0_i32 = arith.constant 0 : i32
    %c0_i32_0 = arith.constant 0 : i32
    return %arg0, %c0_i32 : i32, i32
  }
}

</mosaic_0001>

<bundles_post_ra>
// kernel: mlp_forward.1
= control target key start
LH: loop header
LB: loop body
LE: loop exit
PB: predicated region body
PF: predicated region fallthrough
CT: control target
= control target key end

     0   :  { %14 = vsyncpa [#allocation3], 0  ;;  %s506_s0 = inlined_call_operand.vmem [shape: f32[8,128], index: 0, kind: input, shape index: {}]   ;;  %s507_s1 = inlined_call_operand.hbm [shape: f32[128,128], index: 1, kind: input, shape index: {}]   ;;  %s508_s2 = inlined_call_operand.vmem [shape: f32[1,128], index: 2, kind: input, shape index: {}]   ;;  %s509_s3 = inlined_call_operand.hbm [shape: f32[128,128], index: 3, kind: input, shape index: {}]   ;;  %s510_s4 = inlined_call_operand.vmem [shape: f32[1,128], index: 4, kind: input, shape index: {}]   ;;  %s511_s5 = inlined_call_operand.hbm [shape: f32[128,128], index: 5, kind: input, shape index: {}]   ;;  %s512_s6 = inlined_call_operand.vmem [shape: f32[1,128], index: 6, kind: input, shape index: {}]   ;;  %s513_s7 = inlined_call_operand.hbm [shape: f32[128,128], index: 7, kind: input, shape index: {}]   ;;  %s514_s8 = inlined_call_operand.vmem [shape: f32[1,128], index: 8, kind: input, shape index: {}]   ;;  %s515_s9 = inlined_call_operand.hbm [shape: f32[8,128], index: 9, kind: output, shape index: {}]  }
   0x1   :  { %15 = vsyncpa [#allocation6], 0 }
   0x2   :  { %16 = vsyncpa [#allocation9], 0 }
   0x3   :  { %17 = vsyncpa [#allocation4], 0  ;;  %s39_s11 = sshll.u32 %s509_s3, 4  ;;  %s419_s12 = smov [#allocation5]   ;;  %s40_s11 = int_to_ptr.hbm [resolvable:$true] %s39_s11 }
   0x4   :  { %s41_s13 = sshll.u32 %s419_s12, 4  ;;  %s24_s16 = sshll.u32 %s507_s1, 4  ;;  %s42_s13 = int_to_ptr.vmem [resolvable:$true] %s41_s13  ;;  %s25_s16 = int_to_ptr.hbm [resolvable:$true] %s24_s16 }
   0x5   :  { %s420_s17 = smov 128   ;;  %s421_s18 = smov 8  }
   0x6   :  { %47 = dma.hbm_to_vmem [thread:$0]  %s40_s11, 2048, %s42_s13, [#allocation6], %s420_s17, %s420_s17, %s421_s18  }
   0x7   :  { %s422_s19 = smov [#allocation2]   ;;  %s54_s23 = sshll.u32 %s511_s5, 4  ;;  %s55_s23 = int_to_ptr.hbm [resolvable:$true] %s54_s23 }
   0x8   :  { %s26_s20 = sshll.u32 %s422_s19, 4  ;;  %s69_s25 = sshll.u32 %s513_s7, 4  ;;  %s27_s20 = int_to_ptr.vmem [resolvable:$true] %s26_s20  ;;  %s70_s25 = int_to_ptr.hbm [resolvable:$true] %s69_s25 }
   0x9   :  { %32 = dma.hbm_to_vmem [thread:$0]  %s25_s16, 2048, %s27_s20, [#allocation3], %s420_s17, %s420_s17, %s421_s18  }
   0xa   :  { %s423_s26 = smov [#allocation7]   ;;  %s424_s1 = smov [#allocation8]  }
   0xb   :  { %s56_s27 = sshll.u32 %s423_s26, 4  ;;  %s71_s28 = sshll.u32 %s424_s1, 4  ;;  %s57_s27 = int_to_ptr.vmem [resolvable:$true] %s56_s27  ;;  %s72_s28 = int_to_ptr.vmem [resolvable:$true] %s71_s28 }
   0xc   :  { %62 = dma.hbm_to_vmem [thread:$0]  %s55_s23, 2048, %s57_s27, [#allocation6], %s420_s17, %s420_s17, %s421_s18  }
   0xd   :  { %77 = dma.hbm_to_vmem [thread:$0]  %s70_s25, 2048, %s72_s28, [#allocation9], %s420_s17, %s420_s17, %s421_s18  }
   0xe   :  { %411 = dma.done.wait [#allocation3], 2048  }
   0xf   :  { %412 = vsyncadd [#allocation3], 4294965248 }
  0x10   :  { %413 = dma.done.wait [#allocation6], 4096  }
  0x11   :  { %414 = vsyncadd [#allocation6], 4294963200 }
  0x12   :  { %415 = dma.done.wait [#allocation9], 2048  }
  0x13   :  { %416 = vsyncadd [#allocation9], 4294965248  ;;  %v112_v0 = vld [vmem:[#allocation2 + $0x78] sm:$0xff]  ;;  %v111_v1 = vld [vmem:[#allocation2 + $0x70] sm:$0xff]  ;;  %s425_s13 = smov [#allocation10]   ;;  %s268_s17 = sshll.u32 %s515_s9, 4  ;;  %s269_s17 = int_to_ptr.hbm [resolvable:$true] %s268_s17 }
  0x14   :  { %117 = vmatpush.msra.mxu0 %v112_v0  ;;  %v110_v2 = vld [vmem:[#allocation2 + $0x68] sm:$0xff]  ;;  %v109_v3 = vld [vmem:[#allocation2 + $0x60] sm:$0xff]  ;;  %v153_v4 = vld [vmem:[#allocation5 + $0x78] sm:$0xff]  ;;  %s266_s14 = sshll.u32 %s425_s13, 4  ;;  %s267_s14 = int_to_ptr.vmem [resolvable:$true] %s266_s14 }
  0x15   :  { %v108_v5 = vld [vmem:[#allocation2 + $0x58] sm:$0xff]  ;;  %158 = vmatpush.msra.mxu1 %v153_v4  ;;  %v152_v6 = vld [vmem:[#allocation5 + $0x70] sm:$0xff]  ;;  %v151_v7 = vld [vmem:[#allocation5 + $0x68] sm:$0xff] }
  0x16   :  { %118 = vmatpush.msra.mxu0 %v111_v1  ;;  %v107_v8 = vld [vmem:[#allocation2 + $0x50] sm:$0xff]  ;;  %v150_v9 = vld [vmem:[#allocation5 + $0x60] sm:$0xff]  ;;  %v106_v10 = vld [vmem:[#allocation2 + $0x48] sm:$0xff] }
  0x17   :  { %159 = vmatpush.msra.mxu1 %v152_v6  ;;  %v149_v11 = vld [vmem:[#allocation5 + $0x58] sm:$0xff]  ;;  %v105_v12 = vld [vmem:[#allocation2 + $0x40] sm:$0xff]  ;;  %v148_v13 = vld [vmem:[#allocation5 + $0x50] sm:$0xff] }
  0x18   :  { %119 = vmatpush.msra.mxu0 %v110_v2  ;;  %v104_v14 = vld [vmem:[#allocation2 + $0x38] sm:$0xff]  ;;  %v147_v15 = vld [vmem:[#allocation5 + $0x48] sm:$0xff]  ;;  %v103_v16 = vld [vmem:[#allocation2 + $0x30] sm:$0xff] }
  0x19   :  { %160 = vmatpush.msra.mxu1 %v151_v7  ;;  %v146_v17 = vld [vmem:[#allocation5 + $0x40] sm:$0xff]  ;;  %v102_v18 = vld [vmem:[#allocation2 + $0x28] sm:$0xff]  ;;  %v145_v19 = vld [vmem:[#allocation5 + $0x38] sm:$0xff] }
  0x1a   :  { %120 = vmatpush.msra.mxu0 %v109_v3  ;;  %v101_v20 = vld [vmem:[#allocation2 + $0x20] sm:$0xff]  ;;  %v144_v21 = vld [vmem:[#allocation5 + $0x30] sm:$0xff]  ;;  %v100_v22 = vld [vmem:[#allocation2 + $0x18] sm:$0xff] }
  0x1b   :  { %161 = vmatpush.msra.mxu1 %v150_v9  ;;  %v143_v23 = vld [vmem:[#allocation5 + $0x28] sm:$0xff]  ;;  %v99_v24 = vld [vmem:[#allocation2 + $0x10] sm:$0xff]  ;;  %v142_v25 = vld [vmem:[#allocation5 + $0x20] sm:$0xff] }
  0x1c   :  { %121 = vmatpush.msra.mxu0 %v108_v5  ;;  %v98_v26 = vld [vmem:[#allocation2 + $0x8] sm:$0xff]  ;;  %v141_v27 = vld [vmem:[#allocation5 + $0x18] sm:$0xff]  ;;  %v97_v28 = vld [vmem:[#allocation2] sm:$0xff] }
  0x1d   :  { %162 = vmatpush.msra.mxu1 %v149_v11  ;;  %v96_v29 = vld [vmem:[%s506_s0] sm:$0xff]  ;;  %v140_v30 = vld [vmem:[#allocation5 + $0x10] sm:$0xff]  ;;  %v139_v31 = vld [vmem:[#allocation5 + $0x8] sm:$0xff] }
  0x1e   :  { %122 = vmatpush.msra.mxu0 %v107_v8  ;;  %v138_v32 = vld [vmem:[#allocation5] sm:$0xff]  ;;  %v194_v33 = vld [vmem:[#allocation7 + $0x78] sm:$0xff]  ;;  %v193_v34 = vld [vmem:[#allocation7 + $0x70] sm:$0xff] }
  0x1f   :  { %163 = vmatpush.msra.mxu1 %v148_v13  ;;  %199 = vmatpush.msra.mxu2 %v194_v33  ;;  %v192_v35 = vld [vmem:[#allocation7 + $0x68] sm:$0xff]  ;;  %v191_v36 = vld [vmem:[#allocation7 + $0x60] sm:$0xff]  ;;  %v190_v37 = vld [vmem:[#allocation7 + $0x58] sm:$0xff] }
  0x20   :  { %123 = vmatpush.msra.mxu0 %v106_v10  ;;  %v189_v38 = vld [vmem:[#allocation7 + $0x50] sm:$0xff]  ;;  %v188_v39 = vld [vmem:[#allocation7 + $0x48] sm:$0xff]  ;;  %v187_v40 = vld [vmem:[#allocation7 + $0x40] sm:$0xff] }
  0x21   :  { %164 = vmatpush.msra.mxu1 %v147_v15  ;;  %200 = vmatpush.msra.mxu2 %v193_v34  ;;  %v186_v41 = vld [vmem:[#allocation7 + $0x38] sm:$0xff]  ;;  %v185_v42 = vld [vmem:[#allocation7 + $0x30] sm:$0xff]  ;;  %v184_v43 = vld [vmem:[#allocation7 + $0x28] sm:$0xff] }
  0x22   :  { %124 = vmatpush.msra.mxu0 %v105_v12  ;;  %v183_v44 = vld [vmem:[#allocation7 + $0x20] sm:$0xff]  ;;  %v182_v45 = vld [vmem:[#allocation7 + $0x18] sm:$0xff]  ;;  %v181_v50 = vld [vmem:[#allocation7 + $0x10] sm:$0xff] }
  0x23   :  { %165 = vmatpush.msra.mxu1 %v146_v17  ;;  %201 = vmatpush.msra.mxu2 %v192_v35  ;;  %v287_v46 = vld [vmem:[%s508_s2] ss:$0 sm:$0xff]  ;;  %v180_v51 = vld [vmem:[#allocation7 + $0x8] sm:$0xff]  ;;  %v235_v53 = vld [vmem:[#allocation8 + $0x78] sm:$0xff] }
  0x24   :  { %125 = vmatpush.msra.mxu0 %v104_v14  ;;  %v179_v52 = vld [vmem:[#allocation7] sm:$0xff]  ;;  %v234_v54 = vld [vmem:[#allocation8 + $0x70] sm:$0xff]  ;;  %240 = vmatpush.msra.mxu3 %v235_v53  ;;  %v233_v55 = vld [vmem:[#allocation8 + $0x68] sm:$0xff] }
  0x25   :  { %166 = vmatpush.msra.mxu1 %v145_v19  ;;  %202 = vmatpush.msra.mxu2 %v191_v36  ;;  %v232_v56 = vld [vmem:[#allocation8 + $0x60] sm:$0xff]  ;;  %v231_v57 = vld [vmem:[#allocation8 + $0x58] sm:$0xff]  ;;  %v230_v58 = vld [vmem:[#allocation8 + $0x50] sm:$0xff] }
  0x26   :  { %126 = vmatpush.msra.mxu0 %v103_v16  ;;  %241 = vmatpush.msra.mxu3 %v234_v54  ;;  %v229_v59 = vld [vmem:[#allocation8 + $0x48] sm:$0xff]  ;;  %v228_v60 = vld [vmem:[#allocation8 + $0x40] sm:$0xff]  ;;  %v227_v61 = vld [vmem:[#allocation8 + $0x38] sm:$0xff] }
  0x27   :  { %167 = vmatpush.msra.mxu1 %v144_v21  ;;  %203 = vmatpush.msra.mxu2 %v190_v37  ;;  %v226_v62 = vld [vmem:[#allocation8 + $0x30] sm:$0xff]  ;;  %v225_v63 = vld [vmem:[#allocation8 + $0x28] sm:$0xff]  ;;  %v224_v0 = vld [vmem:[#allocation8 + $0x20] sm:$0xff] }
  0x28   :  { %127 = vmatpush.msra.mxu0 %v102_v18  ;;  %242 = vmatpush.msra.mxu3 %v233_v55  ;;  %v223_v1 = vld [vmem:[#allocation8 + $0x18] sm:$0xff]  ;;  %v288_v2 = vld [vmem:[%s510_s4] ss:$0 sm:$0xff]  ;;  %v222_v6 = vld [vmem:[#allocation8 + $0x10] sm:$0xff] }
  0x29   :  { %168 = vmatpush.msra.mxu1 %v143_v23  ;;  %204 = vmatpush.msra.mxu2 %v189_v38  ;;  %v221_v7 = vld [vmem:[#allocation8 + $0x8] sm:$0xff]  ;;  %v220_v8 = vld [vmem:[#allocation8] sm:$0xff] }
  0x2a   :  { %128 = vmatpush.msra.mxu0 %v101_v20  ;;  %243 = vmatpush.msra.mxu3 %v232_v56  ;;  %v289_v9 = vld [vmem:[%s512_s6] ss:$0 sm:$0xff] }
  0x2b   :  { %169 = vmatpush.msra.mxu1 %v142_v25  ;;  %205 = vmatpush.msra.mxu2 %v188_v39  ;;  %v290_v13 = vld [vmem:[%s514_s8] ss:$0 sm:$0xff] }
  0x2c   :  { %129 = vmatpush.msra.mxu0 %v100_v22  ;;  %244 = vmatpush.msra.mxu3 %v231_v57 }
  0x2d   :  { %170 = vmatpush.msra.mxu1 %v141_v27  ;;  %206 = vmatpush.msra.mxu2 %v187_v40 }
  0x2e   :  { %130 = vmatpush.msra.mxu0 %v99_v24  ;;  %245 = vmatpush.msra.mxu3 %v230_v58 }
  0x2f   :  { %171 = vmatpush.msra.mxu1 %v140_v30  ;;  %207 = vmatpush.msra.mxu2 %v186_v41 }
  0x30   :  { %131 = vmatpush.msra.mxu0 %v98_v26  ;;  %246 = vmatpush.msra.mxu3 %v229_v59 }
  0x31   :  { %172 = vmatpush.msra.mxu1 %v139_v31  ;;  %208 = vmatpush.msra.mxu2 %v185_v42 }
  0x32   :  { %132 = vmatpush.msra.mxu0 %v97_v28  ;;  %247 = vmatpush.msra.mxu3 %v228_v60 }
  0x33   :  { %133 = vmatmul.f32.vlgmr.msra.gmra.mxu0 %v96_v29  ;;  %173 = vmatpush.msra.mxu1 %v138_v32 }
  0x34   :  { %209 = vmatpush.msra.mxu2 %v184_v43  ;;  %248 = vmatpush.msra.mxu3 %v227_v61 }
  0x36   :  { %210 = vmatpush.msra.mxu2 %v183_v44  ;;  %249 = vmatpush.msra.mxu3 %v226_v62 }
  0x38   :  { %211 = vmatpush.msra.mxu2 %v182_v45  ;;  %250 = vmatpush.msra.mxu3 %v225_v63 }
  0x3a   :  { %212 = vmatpush.msra.mxu2 %v181_v50  ;;  %251 = vmatpush.msra.mxu3 %v224_v0 }
  0x3c   :  { %213 = vmatpush.msra.mxu2 %v180_v51  ;;  %252 = vmatpush.msra.mxu3 %v223_v1 }
  0x3e   :  { %214 = vmatpush.msra.mxu2 %v179_v52  ;;  %253 = vmatpush.msra.mxu3 %v222_v6 }
  0x40   :  { %254 = vmatpush.msra.mxu3 %v221_v7 }
  0x42   :  { %255 = vmatpush.msra.mxu3 %v220_v8 }
  0xb0   :  { %v134_v47 = vpop.f32.mrf.mxu0 }
  0xb1   :  { %v135_v48 = vadd.f32 %v287_v46, %v134_v47 }
  0xb3   :  { %v137_v49 = vmax.f32 %v135_v48, 0.0 }
  0xb5   :  { %174 = vmatmul.f32.vlgmr.msra.gmra.mxu1 %v137_v49 }
 0x132   :  { %v175_v3 = vpop.f32.mrf.mxu1 }
 0x133   :  { %v176_v4 = vadd.f32 %v288_v2, %v175_v3 }
 0x135   :  { %v178_v5 = vmax.f32 %v176_v4, 0.0 }
 0x137   :  { %215 = vmatmul.f32.vlgmr.msra.gmra.mxu2 %v178_v5 }
 0x1ba   :  { %v216_v10 = vpop.f32.mrf.mxu2 }
 0x1bb   :  { %v217_v11 = vadd.f32 %v289_v9, %v216_v10 }
 0x1bd   :  { %v219_v12 = vmax.f32 %v217_v11, 0.0 }
 0x1bf   :  { %256 = vmatmul.f32.vlgmr.msra.gmra.mxu3 %v219_v12 }
 0x242   :  { %v257_v14 = vpop.f32.mrf.mxu3 }
 0x243   :  { %v258_v15 = vadd.f32 %v290_v13, %v257_v14 }
 0x245   :  { %260 = vst [vmem:[#allocation10] sm:$0xff] %v258_v15 }
 0x246   :  { %271 = dma.vmem_to_hbm [thread:$0]  %s267_s14, 128, %s269_s17, [#allocation4]  }
 0x247   :  { %417 = dma.done.wait [#allocation4], 128  }
 0x248   :  { %418 = vsyncadd [#allocation4], 4294967168 }
 0x249   :  { %276 = vsyncpa [#allocation3], 1 }
 0x24a   :  { %277 = vsyncpa [#allocation6], 1 }
 0x24b   :  { %278 = vsyncpa [#allocation9], 1 }
 0x24c   :  { %279 = vsyncpa [#allocation4], 1 }

</bundles_post_ra>
